<compile_context>
chip_gen: v5e
topology: v5e:2x2
jax: 0.10.0
libtpu: 0.0.40
codegen_flags: <defaults>
</compile_context>

<pallas_src>
import functools

import jax
import jax.numpy as jnp
from jax import lax
from jax.experimental import pallas as pl
from jax.experimental.pallas import tpu as pltpu

# ---- module hyper-parameters (from bigram.py) ----
N_EMBD = 10
BLOCK_SIZE = 12
N_HEAD = 2
HEAD_SIZE = N_EMBD // N_HEAD
HIDDEN = 4 * N_EMBD
LN_EPS = 1e-5
NEG_BIG = -1e30          # finite "-inf": exp underflows to exactly 0, no NaN risk

# ---- packed parameter slab layout (single (80, 40) f32 slab) ----
#   rows  0:10, cols  0:30 -> [wq | wk | wv]   (fused QKV weight, (C, 3C))
#   rows  0:10, cols 30:40 -> wp               (output projection, (C, C))
#   rows 16:26, cols  0:40 -> w1               (C, 4C)
#   rows 32:72, cols  0:10 -> w2               (4C, C)
#   rows 72:80             -> vectors: ln1w, ln1b, bp, ln2w, ln2b, b1, b2, zero
W_ROW_QKVP = 0
W_ROW_W1 = 16            # 8-sublane-aligned section starts
W_ROW_W2 = 32
V_ROW = 72
V_LN1W, V_LN1B, V_BP, V_LN2W, V_LN2B, V_B1, V_B2 = range(7)
SLAB_ROWS = V_ROW + 8           # 80
SLAB_COLS = 4 * N_EMBD          # 40


def _layernorm(x, w, b):
    mu = jnp.mean(x, axis=-1, keepdims=True)
    var = jnp.mean((x - mu) ** 2, axis=-1, keepdims=True)   # biased var (PyTorch LN)
    return (x - mu) * lax.rsqrt(var + LN_EPS) * w + b


def block_kernel(x_ref, w_ref, o_ref, *, batch, seqlen):
    B, T = batch, seqlen
    x = x_ref[...]                        # (B*T, C) f32
    BT, C = x.shape
    hs = HEAD_SIZE

    # ---- unpack small params (static ref slices; all from the single slab) ----
    ln1w = w_ref[V_ROW + V_LN1W:V_ROW + V_LN1W + 1, 0:C]
    ln1b = w_ref[V_ROW + V_LN1B:V_ROW + V_LN1B + 1, 0:C]
    bp   = w_ref[V_ROW + V_BP:V_ROW + V_BP + 1, 0:C]
    ln2w = w_ref[V_ROW + V_LN2W:V_ROW + V_LN2W + 1, 0:C]
    ln2b = w_ref[V_ROW + V_LN2B:V_ROW + V_LN2B + 1, 0:C]
    b1   = w_ref[V_ROW + V_B1:V_ROW + V_B1 + 1, 0:HIDDEN]
    b2   = w_ref[V_ROW + V_B2:V_ROW + V_B2 + 1, 0:C]

    # ---- self-attention branch: sa(ln1(x)) ----
    xn = _layernorm(x, ln1w, ln1b)
    scale = C ** -0.5                     # full embedding dim, as in Head.forward

    # Fused QKV projection: one (BT,C) x (C,3C) matmul, then static lane slices.
    wqkv = w_ref[W_ROW_QKVP:W_ROW_QKVP + C, 0:3 * C]
    xqkv = jnp.dot(xn, wqkv, preferred_element_type=jnp.float32)      # (BT, 3C)

    # Batch-block-diagonal causal mask over the flattened (BT, BT) score matrix,
    # built from comparisons only (no vector int div/mod).
    row = lax.broadcasted_iota(jnp.int32, (BT, BT), 0)
    col = lax.broadcasted_iota(jnp.int32, (BT, BT), 1)
    mask = row >= col
    for b in range(1, B):                 # row/col on the same side of each batch boundary
        mask = mask & ~((col < b * T) & (row >= b * T))

    head_outs = []
    for h in range(N_HEAD):               # static unroll, H=2
        q = xqkv[:, h * hs:(h + 1) * hs]                       # (BT, hs)
        k = xqkv[:, C + h * hs:C + (h + 1) * hs]               # (BT, hs)
        v = xqkv[:, 2 * C + h * hs:2 * C + (h + 1) * hs]       # (BT, hs)

        # q @ k^T as a single NT matmul -> (BT, BT)
        wei = lax.dot_general(q, k, (((1,), (1,)), ((), ())),
                              preferred_element_type=jnp.float32) * scale
        wei = jnp.where(mask, wei, NEG_BIG)
        wei = wei - jnp.max(wei, axis=-1, keepdims=True)
        e = jnp.exp(wei)
        p = e * pl.reciprocal(jnp.sum(e, axis=-1, keepdims=True), approx=True)
        # attention dropout: identity in eval mode
        head_outs.append(jnp.dot(p, v, preferred_element_type=jnp.float32))   # (BT, hs)

    head_out = jnp.concatenate(head_outs, axis=-1)              # (BT, C)
    wp = w_ref[0:C, 3 * C:4 * C]                                 # row-aligned (C, C)
    sa = jnp.dot(head_out, wp, preferred_element_type=jnp.float32)
    x1 = x + sa + bp                      # residual 1 (proj dropout: identity)

    # ---- feed-forward branch: ffwd(ln2(x1)) ----
    xn2 = _layernorm(x1, ln2w, ln2b)
    w1 = w_ref[W_ROW_W1:W_ROW_W1 + C, 0:HIDDEN]        # (C, 4C)
    w2 = w_ref[W_ROW_W2:W_ROW_W2 + HIDDEN, 0:C]        # (4C, C)
    hdn = jnp.maximum(jnp.dot(xn2, w1, preferred_element_type=jnp.float32) + b1, 0.0)
    ff = jnp.dot(hdn, w2, preferred_element_type=jnp.float32) + b2
    # FFN dropout: identity in eval mode

    o_ref[...] = x1 + ff                  # single (B*T, C) store


def pack_params(p):
    """Pack the 13 small parameter arrays into one VMEM-friendly slab."""
    W = jnp.zeros((SLAB_ROWS, SLAB_COLS), jnp.float32)
    qkvp = jnp.concatenate([p["wq"], p["wk"], p["wv"], p["wp"]], axis=1)   # (C, 4C)
    W = W.at[W_ROW_QKVP:W_ROW_QKVP + N_EMBD, 0:4 * N_EMBD].set(qkvp)
    W = W.at[W_ROW_W1:W_ROW_W1 + N_EMBD, 0:HIDDEN].set(p["w1"])
    W = W.at[W_ROW_W2:W_ROW_W2 + HIDDEN, 0:N_EMBD].set(p["w2"])

    def padded(v):
        v = v.reshape(-1)
        return jnp.pad(v, (0, SLAB_COLS - v.shape[0]))

    vecs = jnp.stack([
        padded(p["ln1w"]), padded(p["ln1b"]), padded(p["bp"]),
        padded(p["ln2w"]), padded(p["ln2b"]),
        padded(p["b1"]), padded(p["b2"]),
        jnp.zeros((SLAB_COLS,), jnp.float32),
    ], axis=0)                                                             # (8, 40)
    W = W.at[V_ROW:V_ROW + 8, :].set(vecs)
    return W


def transformer_block(x, w_slab):
    """x: (B, T, C) float32; w_slab: (80, 40) from pack_params."""
    B, T, C = x.shape
    assert C == N_EMBD and T <= BLOCK_SIZE
    BT = B * T
    x2d = x.reshape(BT, C)

    flops = (2 * BT * C * 3 * C                         # fused QKV
             + N_HEAD * (2 * BT * BT * HEAD_SIZE * 2)   # scores + p@v per head
             + 2 * BT * C * C                           # output projection
             + 2 * BT * C * HIDDEN + 2 * BT * HIDDEN * C)  # FFN
    transcendentals = N_HEAD * BT * BT + 6 * BT         # exp + reciprocal/rsqrt
    bytes_accessed = 2 * BT * C * 4 + SLAB_ROWS * SLAB_COLS * 4

    kernel = functools.partial(block_kernel, batch=B, seqlen=T)
    out2d = pl.pallas_call(
        kernel,
        out_shape=jax.ShapeDtypeStruct((BT, C), jnp.float32),
        grid=(1,),                        # single step: whole problem per invocation
        in_specs=[
            pl.BlockSpec((BT, C), lambda i: (0, 0)),
            pl.BlockSpec((SLAB_ROWS, SLAB_COLS), lambda i: (0, 0)),
        ],
        out_specs=pl.BlockSpec((BT, C), lambda i: (0, 0)),
        compiler_params=pltpu.CompilerParams(
            dimension_semantics=("arbitrary",)),
        cost_estimate=pl.CostEstimate(flops=flops,
                                      transcendentals=transcendentals,
                                      bytes_accessed=bytes_accessed),
    )(x2d, w_slab)
    return out2d.reshape(B, T, C)


def init_params(key):
    ks = jax.random.split(key, 8)
    s = 0.1
    return {
        "ln1w": jnp.ones((N_EMBD,), jnp.float32),
        "ln1b": jnp.zeros((N_EMBD,), jnp.float32),
        # per-head key/query/value weights concatenated along the output dim
        "wq": s * jax.random.normal(ks[0], (N_EMBD, N_HEAD * HEAD_SIZE), jnp.float32),
        "wk": s * jax.random.normal(ks[1], (N_EMBD, N_HEAD * HEAD_SIZE), jnp.float32),
        "wv": s * jax.random.normal(ks[2], (N_EMBD, N_HEAD * HEAD_SIZE), jnp.float32),
        "wp": s * jax.random.normal(ks[3], (N_HEAD * HEAD_SIZE, N_EMBD), jnp.float32),
        "bp": s * jax.random.normal(ks[4], (N_EMBD,), jnp.float32),
        "ln2w": jnp.ones((N_EMBD,), jnp.float32),
        "ln2b": jnp.zeros((N_EMBD,), jnp.float32),
        "w1": s * jax.random.normal(ks[5], (N_EMBD, HIDDEN), jnp.float32),
        "b1": s * jax.random.normal(ks[6], (HIDDEN,), jnp.float32),
        "w2": s * jax.random.normal(ks[7], (HIDDEN, N_EMBD), jnp.float32),
        "b2": jnp.zeros((N_EMBD,), jnp.float32),
    }


def reference_block(x, p):
    """Pure-JAX reference mirroring the PyTorch forward (eval mode)."""
    def ln(v, w, b):
        mu = jnp.mean(v, -1, keepdims=True)
        var = jnp.mean((v - mu) ** 2, -1, keepdims=True)
        return (v - mu) / jnp.sqrt(var + LN_EPS) * w + b

    B, T, C = x.shape
    xn = ln(x, p["ln1w"], p["ln1b"])
    q = xn @ p["wq"]; k = xn @ p["wk"]; v = xn @ p["wv"]
    mask = jnp.tril(jnp.ones((T, T), bool))
    outs = []
    for h in range(N_HEAD):
        sl = slice(h * HEAD_SIZE, (h + 1) * HEAD_SIZE)
        wei = jnp.einsum("btd,bsd->bts", q[..., sl], k[..., sl]) * (C ** -0.5)
        wei = jnp.where(mask, wei, -jnp.inf)
        wei = jax.nn.softmax(wei, axis=-1)
        outs.append(jnp.einsum("bts,bsd->btd", wei, v[..., sl]))
    sa = jnp.concatenate(outs, -1) @ p["wp"] + p["bp"]
    x1 = x + sa
    xn2 = ln(x1, p["ln2w"], p["ln2b"])
    ff = jnp.maximum(xn2 @ p["w1"] + p["b1"], 0.0) @ p["w2"] + p["b2"]
    return x1 + ff


if __name__ == "__main__":
    key = jax.random.PRNGKey(0)
    kx, kp = jax.random.split(key)

    B, T = 2, 8                           # T <= block_size (12)
    x = jax.random.normal(kx, (B, T, N_EMBD), jnp.float32)
    params = init_params(kp)
    w_slab = pack_params(params)          # packed once, reused across calls

    out = transformer_block(x, w_slab)
    out = jax.block_until_ready(out)

    ref = reference_block(x, params)
    assert out.shape == (B, T, N_EMBD)
    # approx reciprocal (EUP) in the softmax -> slightly looser tolerance
    assert jnp.allclose(out, ref, atol=2e-3, rtol=2e-3), "mismatch vs JAX reference"

    print("KERNEL_OK")
</pallas_src>

<mosaic_0001>
module attributes {stable_mosaic.version = 11 : i64} {
  func.func @block_kernel(%arg0: i32, %arg1: memref<16x10xf32, #tpu.memory_space<vmem>>, %arg2: memref<80x40xf32, #tpu.memory_space<vmem>>, %arg3: memref<16x10xf32, #tpu.memory_space<vmem>>) attributes {dimension_semantics = [#tpu.dimension_semantics<arbitrary>], iteration_bounds = array<i64: 1>, scalar_prefetch = 0 : i64, scratch_operands = 0 : i64, tpu.core_type = #tpu.core_type<tc>, window_params = [{pipeline_mode = #tpu.pipeline_mode<synchronous>, transform_indices = @transform_0, window_bounds = array<i64: 16, 10>}, {pipeline_mode = #tpu.pipeline_mode<synchronous>, transform_indices = @transform_1, window_bounds = array<i64: 80, 40>}, {pipeline_mode = #tpu.pipeline_mode<synchronous>, transform_indices = @transform_2, window_bounds = array<i64: 16, 10>}]} {
    %c0 = arith.constant 0 : index
    %c0_0 = arith.constant 0 : index
    %0 = vector.load %arg1[%c0, %c0_0] : memref<16x10xf32, #tpu.memory_space<vmem>>, vector<16x10xf32>
    %c72 = arith.constant 72 : index
    %c0_1 = arith.constant 0 : index
    %1 = vector.load %arg2[%c72, %c0_1] : memref<80x40xf32, #tpu.memory_space<vmem>>, vector<1x10xf32>
    %c73 = arith.constant 73 : index
    %c0_2 = arith.constant 0 : index
    %2 = vector.load %arg2[%c73, %c0_2] : memref<80x40xf32, #tpu.memory_space<vmem>>, vector<1x10xf32>
    %c74 = arith.constant 74 : index
    %c0_3 = arith.constant 0 : index
    %3 = vector.load %arg2[%c74, %c0_3] : memref<80x40xf32, #tpu.memory_space<vmem>>, vector<1x10xf32>
    %c75 = arith.constant 75 : index
    %c0_4 = arith.constant 0 : index
    %4 = vector.load %arg2[%c75, %c0_4] : memref<80x40xf32, #tpu.memory_space<vmem>>, vector<1x10xf32>
    %c76 = arith.constant 76 : index
    %c0_5 = arith.constant 0 : index
    %5 = vector.load %arg2[%c76, %c0_5] : memref<80x40xf32, #tpu.memory_space<vmem>>, vector<1x10xf32>
    %c77 = arith.constant 77 : index
    %c0_6 = arith.constant 0 : index
    %6 = vector.load %arg2[%c77, %c0_6] : memref<80x40xf32, #tpu.memory_space<vmem>>, vector<1x40xf32>
    %c78 = arith.constant 78 : index
    %c0_7 = arith.constant 0 : index
    %7 = vector.load %arg2[%c78, %c0_7] : memref<80x40xf32, #tpu.memory_space<vmem>>, vector<1x10xf32>
    %cst = arith.constant dense<0.000000e+00> : vector<16xf32>
    %8 = vector.multi_reduction <add>, %0, %cst [1] : vector<16x10xf32> to vector<16xf32>
    %9 = vector.shape_cast %8 : vector<16xf32> to vector<16x1xf32>
    %cst_8 = arith.constant 1.000000e+01 : f32
    %10 = vector.broadcast %cst_8 : f32 to vector<16x1xf32>
    %11 = arith.divf %9, %10 : vector<16x1xf32>
    %12 = vector.broadcast %11 : vector<16x1xf32> to vector<16x10xf32>
    %13 = arith.subf %0, %12 : vector<16x10xf32>
    %14 = arith.mulf %13, %13 : vector<16x10xf32>
    %cst_9 = arith.constant dense<0.000000e+00> : vector<16xf32>
    %15 = vector.multi_reduction <add>, %14, %cst_9 [1] : vector<16x10xf32> to vector<16xf32>
    %16 = vector.shape_cast %15 : vector<16xf32> to vector<16x1xf32>
    %cst_10 = arith.constant 1.000000e+01 : f32
    %17 = vector.broadcast %cst_10 : f32 to vector<16x1xf32>
    %18 = arith.divf %16, %17 : vector<16x1xf32>
    %19 = vector.broadcast %11 : vector<16x1xf32> to vector<16x10xf32>
    %20 = arith.subf %0, %19 : vector<16x10xf32>
    %cst_11 = arith.constant 9.99999974E-6 : f32
    %21 = vector.broadcast %cst_11 : f32 to vector<16x1xf32>
    %22 = arith.addf %18, %21 : vector<16x1xf32>
    %23 = math.rsqrt %22 : vector<16x1xf32>
    %24 = vector.broadcast %23 : vector<16x1xf32> to vector<16x10xf32>
    %25 = arith.mulf %20, %24 : vector<16x10xf32>
    %26 = vector.broadcast %1 : vector<1x10xf32> to vector<16x10xf32>
    %27 = arith.mulf %25, %26 : vector<16x10xf32>
    %28 = vector.broadcast %2 : vector<1x10xf32> to vector<16x10xf32>
    %29 = arith.addf %27, %28 : vector<16x10xf32>
    %c0_12 = arith.constant 0 : index
    %c0_13 = arith.constant 0 : index
    %30 = vector.load %arg2[%c0_12, %c0_13] : memref<80x40xf32, #tpu.memory_space<vmem>>, vector<10x30xf32>
    %cst_14 = arith.constant dense<0.000000e+00> : vector<16x30xf32>
    %31 = tpu.matmul %29, %30, %cst_14 {dimension_numbers = #tpu.dot_dimension_numbers<[1], [0], [0], [1], [0, 0, 1, 1], [], []>} : vector<16x10xf32>, vector<10x30xf32>, vector<16x30xf32> -> vector<16x30xf32>
    %32 = tpu.iota {dimensions = array<i32: 0>} : vector<16x16xi32>
    %33 = tpu.iota {dimensions = array<i32: 1>} : vector<16x16xi32>
    %34 = arith.cmpi sge, %32, %33 : vector<16x16xi32>
    %c8_i32 = arith.constant 8 : i32
    %35 = vector.broadcast %c8_i32 : i32 to vector<16x16xi32>
    %36 = arith.cmpi slt, %33, %35 : vector<16x16xi32>
    %c8_i32_15 = arith.constant 8 : i32
    %37 = vector.broadcast %c8_i32_15 : i32 to vector<16x16xi32>
    %38 = arith.cmpi sge, %32, %37 : vector<16x16xi32>
    %39 = arith.andi %36, %38 : vector<16x16xi1>
    %cst_16 = arith.constant dense<true> : vector<16x16xi1>
    %40 = arith.xori %39, %cst_16 : vector<16x16xi1>
    %41 = arith.andi %34, %40 : vector<16x16xi1>
    %42 = vector.extract_strided_slice %31 {offsets = [0, 0], sizes = [16, 5], strides = [1, 1]} : vector<16x30xf32> to vector<16x5xf32>
    %43 = vector.extract_strided_slice %31 {offsets = [0, 10], sizes = [16, 5], strides = [1, 1]} : vector<16x30xf32> to vector<16x5xf32>
    %44 = vector.extract_strided_slice %31 {offsets = [0, 20], sizes = [16, 5], strides = [1, 1]} : vector<16x30xf32> to vector<16x5xf32>
    %cst_17 = arith.constant dense<0.000000e+00> : vector<16x16xf32>
    %45 = tpu.matmul %42, %43, %cst_17 {dimension_numbers = #tpu.dot_dimension_numbers<[1], [1], [0], [0], [0, 0, 1, 0], [], []>} : vector<16x5xf32>, vector<16x5xf32>, vector<16x16xf32> -> vector<16x16xf32>
    %cst_18 = arith.constant 0.316227764 : f32
    %46 = vector.broadcast %cst_18 : f32 to vector<16x16xf32>
    %47 = arith.mulf %45, %46 : vector<16x16xf32>
    %cst_19 = arith.constant -1.000000e+30 : f32
    %48 = vector.broadcast %cst_19 : f32 to vector<16x16xf32>
    %49 = arith.select %41, %47, %48 : vector<16x16xi1>, vector<16x16xf32>
    %cst_20 = arith.constant dense<0xFF800000> : vector<16xf32>
    %50 = vector.multi_reduction <maximumf>, %49, %cst_20 [1] : vector<16x16xf32> to vector<16xf32>
    %51 = vector.shape_cast %50 : vector<16xf32> to vector<16x1xf32>
    %52 = vector.broadcast %51 : vector<16x1xf32> to vector<16x16xf32>
    %53 = arith.subf %49, %52 : vector<16x16xf32>
    %54 = math.exp %53 : vector<16x16xf32>
    %cst_21 = arith.constant dense<0.000000e+00> : vector<16xf32>
    %55 = vector.multi_reduction <add>, %54, %cst_21 [1] : vector<16x16xf32> to vector<16xf32>
    %56 = vector.shape_cast %55 : vector<16xf32> to vector<16x1xf32>
    %57 = tpu.reciprocal %56 {approx = true} : vector<16x1xf32> -> vector<16x1xf32>
    %58 = vector.broadcast %57 : vector<16x1xf32> to vector<16x16xf32>
    %59 = arith.mulf %54, %58 : vector<16x16xf32>
    %cst_22 = arith.constant dense<0.000000e+00> : vector<16x5xf32>
    %60 = tpu.matmul %59, %44, %cst_22 {dimension_numbers = #tpu.dot_dimension_numbers<[1], [0], [0], [1], [0, 0, 1, 1], [], []>} : vector<16x16xf32>, vector<16x5xf32>, vector<16x5xf32> -> vector<16x5xf32>
    %61 = vector.extract_strided_slice %31 {offsets = [0, 5], sizes = [16, 5], strides = [1, 1]} : vector<16x30xf32> to vector<16x5xf32>
    %62 = vector.extract_strided_slice %31 {offsets = [0, 15], sizes = [16, 5], strides = [1, 1]} : vector<16x30xf32> to vector<16x5xf32>
    %63 = vector.extract_strided_slice %31 {offsets = [0, 25], sizes = [16, 5], strides = [1, 1]} : vector<16x30xf32> to vector<16x5xf32>
    %cst_23 = arith.constant dense<0.000000e+00> : vector<16x16xf32>
    %64 = tpu.matmul %61, %62, %cst_23 {dimension_numbers = #tpu.dot_dimension_numbers<[1], [1], [0], [0], [0, 0, 1, 0], [], []>} : vector<16x5xf32>, vector<16x5xf32>, vector<16x16xf32> -> vector<16x16xf32>
    %cst_24 = arith.constant 0.316227764 : f32
    %65 = vector.broadcast %cst_24 : f32 to vector<16x16xf32>
    %66 = arith.mulf %64, %65 : vector<16x16xf32>
    %cst_25 = arith.constant -1.000000e+30 : f32
    %67 = vector.broadcast %cst_25 : f32 to vector<16x16xf32>
    %68 = arith.select %41, %66, %67 : vector<16x16xi1>, vector<16x16xf32>
    %cst_26 = arith.constant dense<0xFF800000> : vector<16xf32>
    %69 = vector.multi_reduction <maximumf>, %68, %cst_26 [1] : vector<16x16xf32> to vector<16xf32>
    %70 = vector.shape_cast %69 : vector<16xf32> to vector<16x1xf32>
    %71 = vector.broadcast %70 : vector<16x1xf32> to vector<16x16xf32>
    %72 = arith.subf %68, %71 : vector<16x16xf32>
    %73 = math.exp %72 : vector<16x16xf32>
    %cst_27 = arith.constant dense<0.000000e+00> : vector<16xf32>
    %74 = vector.multi_reduction <add>, %73, %cst_27 [1] : vector<16x16xf32> to vector<16xf32>
    %75 = vector.shape_cast %74 : vector<16xf32> to vector<16x1xf32>
    %76 = tpu.reciprocal %75 {approx = true} : vector<16x1xf32> -> vector<16x1xf32>
    %77 = vector.broadcast %76 : vector<16x1xf32> to vector<16x16xf32>
    %78 = arith.mulf %73, %77 : vector<16x16xf32>
    %cst_28 = arith.constant dense<0.000000e+00> : vector<16x5xf32>
    %79 = tpu.matmul %78, %63, %cst_28 {dimension_numbers = #tpu.dot_dimension_numbers<[1], [0], [0], [1], [0, 0, 1, 1], [], []>} : vector<16x16xf32>, vector<16x5xf32>, vector<16x5xf32> -> vector<16x5xf32>
    %80 = tpu.concatenate %60, %79 in 1 : vector<16x5xf32>, vector<16x5xf32> -> vector<16x10xf32>
    %c0_29 = arith.constant 0 : index
    %c30 = arith.constant 30 : index
    %81 = vector.load %arg2[%c0_29, %c30] : memref<80x40xf32, #tpu.memory_space<vmem>>, vector<10x10xf32>
    %cst_30 = arith.constant dense<0.000000e+00> : vector<16x10xf32>
    %82 = tpu.matmul %80, %81, %cst_30 {dimension_numbers = #tpu.dot_dimension_numbers<[1], [0], [0], [1], [0, 0, 1, 1], [], []>} : vector<16x10xf32>, vector<10x10xf32>, vector<16x10xf32> -> vector<16x10xf32>
    %83 = arith.addf %0, %82 : vector<16x10xf32>
    %84 = vector.broadcast %3 : vector<1x10xf32> to vector<16x10xf32>
    %85 = arith.addf %83, %84 : vector<16x10xf32>
    %cst_31 = arith.constant dense<0.000000e+00> : vector<16xf32>
    %86 = vector.multi_reduction <add>, %85, %cst_31 [1] : vector<16x10xf32> to vector<16xf32>
    %87 = vector.shape_cast %86 : vector<16xf32> to vector<16x1xf32>
    %cst_32 = arith.constant 1.000000e+01 : f32
    %88 = vector.broadcast %cst_32 : f32 to vector<16x1xf32>
    %89 = arith.divf %87, %88 : vector<16x1xf32>
    %90 = vector.broadcast %89 : vector<16x1xf32> to vector<16x10xf32>
    %91 = arith.subf %85, %90 : vector<16x10xf32>
    %92 = arith.mulf %91, %91 : vector<16x10xf32>
    %cst_33 = arith.constant dense<0.000000e+00> : vector<16xf32>
    %93 = vector.multi_reduction <add>, %92, %cst_33 [1] : vector<16x10xf32> to vector<16xf32>
    %94 = vector.shape_cast %93 : vector<16xf32> to vector<16x1xf32>
    %cst_34 = arith.constant 1.000000e+01 : f32
    %95 = vector.broadcast %cst_34 : f32 to vector<16x1xf32>
    %96 = arith.divf %94, %95 : vector<16x1xf32>
    %97 = vector.broadcast %89 : vector<16x1xf32> to vector<16x10xf32>
    %98 = arith.subf %85, %97 : vector<16x10xf32>
    %cst_35 = arith.constant 9.99999974E-6 : f32
    %99 = vector.broadcast %cst_35 : f32 to vector<16x1xf32>
    %100 = arith.addf %96, %99 : vector<16x1xf32>
    %101 = math.rsqrt %100 : vector<16x1xf32>
    %102 = vector.broadcast %101 : vector<16x1xf32> to vector<16x10xf32>
    %103 = arith.mulf %98, %102 : vector<16x10xf32>
    %104 = vector.broadcast %4 : vector<1x10xf32> to vector<16x10xf32>
    %105 = arith.mulf %103, %104 : vector<16x10xf32>
    %106 = vector.broadcast %5 : vector<1x10xf32> to vector<16x10xf32>
    %107 = arith.addf %105, %106 : vector<16x10xf32>
    %c16 = arith.constant 16 : index
    %c0_36 = arith.constant 0 : index
    %108 = vector.load %arg2[%c16, %c0_36] : memref<80x40xf32, #tpu.memory_space<vmem>>, vector<10x40xf32>
    %c32 = arith.constant 32 : index
    %c0_37 = arith.constant 0 : index
    %109 = vector.load %arg2[%c32, %c0_37] : memref<80x40xf32, #tpu.memory_space<vmem>>, vector<40x10xf32>
    %cst_38 = arith.constant dense<0.000000e+00> : vector<16x40xf32>
    %110 = tpu.matmul %107, %108, %cst_38 {dimension_numbers = #tpu.dot_dimension_numbers<[1], [0], [0], [1], [0, 0, 1, 1], [], []>} : vector<16x10xf32>, vector<10x40xf32>, vector<16x40xf32> -> vector<16x40xf32>
    %111 = vector.broadcast %6 : vector<1x40xf32> to vector<16x40xf32>
    %112 = arith.addf %110, %111 : vector<16x40xf32>
    %cst_39 = arith.constant 0.000000e+00 : f32
    %113 = vector.broadcast %cst_39 : f32 to vector<16x40xf32>
    %114 = arith.maximumf %112, %113 : vector<16x40xf32>
    %cst_40 = arith.constant dense<0.000000e+00> : vector<16x10xf32>
    %115 = tpu.matmul %114, %109, %cst_40 {dimension_numbers = #tpu.dot_dimension_numbers<[1], [0], [0], [1], [0, 0, 1, 1], [], []>} : vector<16x40xf32>, vector<40x10xf32>, vector<16x10xf32> -> vector<16x10xf32>
    %116 = vector.broadcast %7 : vector<1x10xf32> to vector<16x10xf32>
    %117 = arith.addf %115, %116 : vector<16x10xf32>
    %118 = arith.addf %85, %117 : vector<16x10xf32>
    %c0_41 = arith.constant 0 : index
    %c0_42 = arith.constant 0 : index
    %119 = vector.load %arg3[%c0_41, %c0_42] : memref<16x10xf32, #tpu.memory_space<vmem>>, vector<16x10xf32>
    tpu.vector_store %arg3[%c0_41, %c0_42], %118 {strides = array<i32>} : memref<16x10xf32, #tpu.memory_space<vmem>>, vector<16x10xf32>,
    return
  }
  func.func @transform_0(%arg0: i32) -> (i32, i32) {
    %c0_i32 = arith.constant 0 : i32
    %c0_i32_0 = arith.constant 0 : i32
    %c0_i32_1 = arith.constant 0 : i32
    return %c0_i32, %c0_i32_0 : i32, i32
  }
  func.func @transform_1(%arg0: i32) -> (i32, i32) {
    %c0_i32 = arith.constant 0 : i32
    %c0_i32_0 = arith.constant 0 : i32
    %c0_i32_1 = arith.constant 0 : i32
    return %c0_i32, %c0_i32_0 : i32, i32
  }
  func.func @transform_2(%arg0: i32) -> (i32, i32) {
    %c0_i32 = arith.constant 0 : i32
    %c0_i32_0 = arith.constant 0 : i32
    %c0_i32_1 = arith.constant 0 : i32
    return %c0_i32, %c0_i32_0 : i32, i32
  }
}

</mosaic_0001>

<bundles_post_ra>
// kernel: tpu_custom_call.1
= control target key start
LH: loop header
LB: loop body
LE: loop exit
PB: predicated region body
PF: predicated region fallthrough
CT: control target
= control target key end

     0   :  { %vm21_vm0 = vcmask 80896   ;;  %s796_s0 = inlined_call_operand.vmem [shape: f32[16,10], index: 0, kind: input, shape index: {}]   ;;  %s797_s1 = inlined_call_operand.vmem [shape: f32[80,40], index: 1, kind: input, shape index: {}]   ;;  %s798_s2 = inlined_call_operand.hbm [shape: f32[16,10], index: 2, kind: output, shape index: {}]  }
   0x1   :  { %v661_v0 = vld [vmem:[%s796_s0] sm:$0xff] }
   0x2   :  { %v22_v1 = vsel %vm21_vm0, %v661_v0, 0.0 }
   0x3   :  { %23 = vadd.xlane.f32.xlu0 %v22_v1 }
   0x4   :  { %7 = vsyncpa [#allocation3], 0  ;;  %v668_v2 = vld [vmem:[%s796_s0 + $0x8] sm:$0xff]  ;;  %v631_v4 = vmov 10.0   ;;  %vm87_vm2 = vcmask 1041408   ;;  %v690_v22 = vld [vmem:[%s797_s1] sm:$0xff]  ;;  %v114_v59 = vlaneseq }
   0x5   :  { %v25_v3 = vsel %vm21_vm0, %v668_v2, 0.0  ;;  %579 = vrcp.f32 %v631_v4  ;;  %v683_v21 = vld [vmem:[%s797_s1 + $0x8] sm:$0x3]  ;;  %s632_s20 = smov 123   ;;  %s633_s21 = smov 113   ;;  %vm136_vm9 = vcmask 39936  }
   0x6   :  { %527 = vmatpush.msk.msra.mxu0 %vm87_vm2, %v683_v21  ;;  %v572_v37 = vld [vmem:[%s797_s1 + $0x48] ss:$0 sm:$0xff]  ;;  %v573_v41 = vld [vmem:[%s797_s1 + $0x49] ss:$0 sm:$0xff]  ;;  %s634_s22 = smov 118   ;;  %v115_v60 = vshrl.u32 %v114_v59, 7 }
   0x7   :  { %v118_v61 = vand.u32 127, %v114_v59  ;;  %vm172_vm11 = vcmask 130048   ;;  %vm635_vm14 = vmmov 1   ;;  %s636_s23 = smov 103   ;;  %s637_s24 = smov 108  }
   0x8   :  { %106 = vmatpush.msra.mxu0 %v690_v22  ;;  %v116_v1 = vadd.s32 8, %v115_v60  ;;  %s638_s25 = smov 98   ;;  %s639_s26 = smov 5  }
   0x9   :  { %vm119_vm10 = vcmp.ge.s32.totalorder %v115_v60, %v118_v61  ;;  %vm121_vm12 = vcmp.lt.s32.totalorder %v118_v61, 8  ;;  %s642_s27 = smov 8  }
   0xa   :  { %vm120_vm13 = vcmp.ge.s32.totalorder %v116_v1, %v118_v61  ;;  %vm127_vm15 = vmxor %vm121_vm12, %vm635_vm14 }
   0xb   :  { %26 = vadd.xlane.f32.xlu0 %v25_v3  ;;  %v580_v5 = vpop.eup %579 }
   0xc   :  { %v29_v6 = vmul.f32 10.0, %v580_v5  ;;  %vm33_vm1 = vweird.f32 %v580_v5 }
   0xe   :  { %v30_v7 = vsub.f32 1.0, %v29_v6 }
  0x10   :  { %v31_v8 = vmul.f32 %v580_v5, %v30_v7 }
  0x12   :  { %v32_v9 = vadd.f32 %v580_v5, %v31_v8 }
  0x14   :  { %v672_v10 = vsel %vm33_vm1, %v580_v5, %v32_v9  ;;  %vm129_vm1 = vmand %vm120_vm13, %vm127_vm15 }
  0x76   :  { %v24_v11 = vpop.xlane.xlu0 %23 }
  0x77   :  { %v35_v12 = vmul.f32 %v672_v10, %v24_v11 }
  0x79   :  { %v37_v13 = vsub.f32 %v661_v0, %v35_v12 }
  0x7b   :  { %v39_v14 = vmul.f32 %v37_v13, %v37_v13 }
  0x7d   :  { %v41_v15 = vsel %vm21_vm0, %v39_v14, 0.0 }
  0x7e   :  { %42 = vadd.xlane.f32.xlu1 %v41_v15  ;;  %v27_v16 = vpop.xlane.xlu0 %26 }
  0x7f   :  { %v36_v17 = vmul.f32 %v672_v10, %v27_v16 }
  0x81   :  { %v38_v18 = vsub.f32 %v668_v2, %v36_v17 }
  0x83   :  { %v40_v19 = vmul.f32 %v38_v18, %v38_v18 }
  0x85   :  { %v44_v20 = vsel %vm21_vm0, %v40_v19, 0.0 }
  0x86   :  { %45 = vadd.xlane.f32.xlu1 %v44_v20 }
  0xf1   :  { %v43_v23 = vpop.xlane.xlu1 %42 }
  0xf2   :  { %v47_v24 = vmul.f32 %v43_v23, %v672_v10 }
  0xf4   :  { %v49_v25 = vadd.f32 1e-05, %v47_v24 }
  0xf6   :  { %581 = vrsqrt.f32 %v49_v25  ;;  %vm57_vm4 = vweird.f32 %v49_v25 }
  0xf9   :  { %v46_v26 = vpop.xlane.xlu1 %45 }
  0xfa   :  { %v48_v27 = vmul.f32 %v46_v26, %v672_v10 }
  0xfc   :  { %v582_v28 = vpop.eup %581  ;;  %v50_v29 = vadd.f32 1e-05, %v48_v27 }
  0xfd   :  { %v52_v30 = vmul.f32 %v582_v28, %v49_v25  ;;  %vm58_vm3 = vweird.f32 %v582_v28 }
  0xfe   :  { %583 = vrsqrt.f32 %v50_v29  ;;  %vm59_vm5 = vmor %vm57_vm4, %vm58_vm3  ;;  %vm67_vm7 = vweird.f32 %v50_v29 }
  0xff   :  { %v53_v31 = vmul.f32 %v582_v28, %v52_v30 }
 0x101   :  { %v54_v32 = vmul.f32 0.5, %v53_v31 }
 0x103   :  { %v55_v33 = vsub.f32 1.5, %v54_v32 }
 0x104   :  { %v584_v34 = vpop.eup %583 }
 0x105   :  { %v56_v35 = vmul.f32 %v582_v28, %v55_v33  ;;  %v62_v36 = vmul.f32 %v584_v34, %v50_v29  ;;  %vm68_vm6 = vweird.f32 %v584_v34 }
 0x106   :  { %vm69_vm8 = vmor %vm67_vm7, %vm68_vm6 }
 0x107   :  { %v60_v38 = vsel %vm59_vm5, %v582_v28, %v56_v35  ;;  %v63_v39 = vmul.f32 %v584_v34, %v62_v36 }
 0x108   :  { %v71_v40 = vmul.f32 %v60_v38, %v37_v13 }
 0x109   :  { %v64_v42 = vmul.f32 0.5, %v63_v39 }
 0x10a   :  { %v74_v43 = vmul.f32 %v572_v37, %v71_v40 }
 0x10b   :  { %v65_v44 = vsub.f32 1.5, %v64_v42 }
 0x10c   :  { %v77_v45 = vadd.f32 %v573_v41, %v74_v43 }
 0x10d   :  { %v66_v46 = vmul.f32 %v584_v34, %v65_v44 }
 0x10e   :  { %528 = vmatmul.msk.f32.vlgmr.msra.gmra.mxu0 %vm21_vm0, %v77_v45 }
 0x10f   :  { %v70_v47 = vsel %vm69_vm8, %v584_v34, %v66_v46  ;;  %vm475_vm8 = vcmask 326656  }
 0x110   :  { %v72_v48 = vmul.f32 %v70_v47, %v38_v18 }
 0x112   :  { %v75_v49 = vmul.f32 %v572_v37, %v72_v48 }
 0x114   :  { %v78_v50 = vadd.f32 %v573_v41, %v75_v49 }
 0x116   :  { %529 = vmatmul.msk.f32.gmra.mxu0 %vm21_vm0, %v78_v50 }
 0x18b   :  { %v108_v51 = vpop.f32.mrf.mxu0 }
 0x18c   :  { %230 = vrot.lane.b32.xlu0 %v108_v51, %s632_s20 }
 0x193   :  { %v111_v52 = vpop.f32.mrf.mxu0 }
 0x194   :  { %232 = vrot.lane.b32.xlu1 %v111_v52, %s632_s20  ;;  %236 = vrot.lane.b32.xlu2 %v111_v52, %s633_s21  ;;  %v562_v18 = vpack.i.bf16 %v108_v51, %v111_v52 }
 0x19c   :  { %234 = vrot.lane.b32.xlu2 %v108_v51, %s633_s21 }
 0x1a4   :  { %134 = vrot.lane.b32.xlu2 %v111_v52, %s634_s22 }
 0x1ac   :  { %132 = vrot.lane.b32.xlu2 %v108_v51, %s634_s22  ;;  %s640_s22 = smov [#allocation2]  }
 0x1ee   :  { %v237_v53 = vpop.permute.xlu2 %236 }
 0x1ef   :  { %536 = vmatpush.xpose.msk.msra.mxu3 %vm136_vm9, %v237_v53 }
 0x1f6   :  { %v235_v54 = vpop.permute.xlu2 %234 }
 0x1f7   :  { %537 = vmatpush.xpose.msk.msra.mxu3 %vm136_vm9, %v235_v54 }
 0x1fe   :  { %v135_v55 = vpop.permute.xlu2 %134  ;;  %v231_v56 = vpop.permute.xlu0 %230 }
 0x1ff   :  { %530 = vmatpush.xpose.msk.msra.mxu1 %vm136_vm9, %v135_v55  ;;  %538 = vmatmul.msk.f32.vlgmr.msra.gmra.mxu3 %vm136_vm9, %v231_v56 }
 0x206   :  { %v233_v57 = vpop.permute.xlu1 %232  ;;  %v133_v58 = vpop.permute.xlu2 %132 }
 0x207   :  { %531 = vmatpush.xpose.msk.msra.mxu1 %vm136_vm9, %v133_v58  ;;  %539 = vmatmul.msk.f32.gmra.mxu3 %vm136_vm9, %v233_v57 }
 0x20a   :  { %532 = vmatmul.msk.f32.vlgmr.msra.gmra.mxu1 %vm136_vm9, %v108_v51 }
 0x212   :  { %533 = vmatmul.msk.f32.gmra.mxu1 %vm136_vm9, %v111_v52 }
 0x282   :  { %v263_v62 = vpop.f32.mrf.mxu3 }
 0x283   :  { %v269_v63 = vmul.f32 0.31622776, %v263_v62 }
 0x285   :  { %v271_v3 = vsel %vm119_vm10, %v269_v63, -1e+30 }
 0x286   :  { %v273_v4 = vsel %vm172_vm11, %v271_v3, -inf }
 0x287   :  { %v162_v5 = vpop.f32.mrf.mxu1  ;;  %274 = vmax.xlane.f32.xlu2 %v273_v4 }
 0x288   :  { %v168_v6 = vmul.f32 0.31622776, %v162_v5 }
 0x28a   :  { %v266_v7 = vpop.f32.mrf.mxu3  ;;  %v170_v8 = vsel %vm119_vm10, %v168_v6, -1e+30 }
 0x28b   :  { %v270_v9 = vmul.f32 0.31622776, %v266_v7  ;;  %v173_v11 = vsel %vm172_vm11, %v170_v8, -inf }
 0x28c   :  { %174 = vmax.xlane.f32.xlu1 %v173_v11 }
 0x28d   :  { %v272_v12 = vsel %vm129_vm1, %v270_v9, -1e+30 }
 0x28e   :  { %v276_v13 = vsel %vm172_vm11, %v272_v12, -inf }
 0x28f   :  { %v165_v14 = vpop.f32.mrf.mxu1  ;;  %277 = vmax.xlane.f32.xlu0 %v276_v13 }
 0x290   :  { %v169_v15 = vmul.f32 0.31622776, %v165_v14 }
 0x292   :  { %v171_v16 = vsel %vm129_vm1, %v169_v15, -1e+30 }
 0x293   :  { %v176_v17 = vsel %vm172_vm11, %v171_v16, -inf }
 0x294   :  { %177 = vmax.xlane.f32.xlu2 %v176_v17 }
 0x2ac   :  { %563 = vrot.lane.b32.xlu2 %v562_v18, %s636_s23  ;;  %s513_s23 = sshll.u32 %s640_s22, 4  ;;  %s514_s23 = int_to_ptr.vmem [resolvable:$true] %s513_s23 }
 0x2fa   :  { %v275_v19 = vpop.xlane.xlu2 %274 }
 0x2fb   :  { %v279_v20 = vsub.f32 %v271_v3, %v275_v19 }
 0x2fd   :  { %v281_v23 = vmul.f32 1.442695, %v279_v20 }
 0x2ff   :  { %585 = vpow2.f32 %v281_v23  ;;  %v175_v24 = vpop.xlane.xlu1 %174 }
 0x300   :  { %v179_v25 = vsub.f32 %v170_v8, %v175_v24 }
 0x302   :  { %v181_v26 = vmul.f32 1.442695, %v179_v25  ;;  %v278_v27 = vpop.xlane.xlu0 %277  ;;  %v433_v25 = vld [vmem:[%s797_s1 + $0x18] sm:$0x3] }
 0x303   :  { %v280_v28 = vsub.f32 %v272_v12, %v278_v27  ;;  %545 = vmatpush.msk.msrb.mxu1 %vm87_vm2, %v433_v25 }
 0x304   :  { %587 = vpow2.f32 %v181_v26  ;;  %v432_v26 = vld [vmem:[%s797_s1 + $0x10] sm:$0xff] }
 0x305   :  { %v586_v29 = vpop.eup %585  ;;  %v283_v30 = vmul.f32 1.442695, %v280_v28  ;;  %464 = vmatpush.msrb.mxu1 %v432_v26 }
 0x306   :  { %v285_v31 = vsel %vm172_vm11, %v586_v29, 0.0 }
 0x307   :  { %589 = vpow2.f32 %v283_v30  ;;  %v178_v32 = vpop.xlane.xlu2 %177  ;;  %286 = vadd.xlane.f32.xlu0 %v285_v31 }
 0x308   :  { %v180_v33 = vsub.f32 %v171_v16, %v178_v32 }
 0x30a   :  { %v183_v34 = vmul.f32 1.442695, %v180_v33  ;;  %v588_v35 = vpop.eup %587 }
 0x30b   :  { %v185_v37 = vsel %vm172_vm11, %v588_v35, 0.0 }
 0x30c   :  { %591 = vpow2.f32 %v183_v34 }
 0x30d   :  { %v590_v36 = vpop.eup %589 }
 0x30e   :  { %v288_v38 = vsel %vm172_vm11, %v590_v36, 0.0 }
 0x30f   :  { %v564_v39 = vpop.permute.xlu2 %563  ;;  %186 = vadd.xlane.f32.xlu0 %v185_v37  ;;  %289 = vadd.xlane.f32.xlu1 %v288_v38  ;;  %v438_v37 = vld [vmem:[%s797_s1 + $0x40] sm:$0xff]  ;;  %v437_v38 = vld [vmem:[%s797_s1 + $0x38] sm:$0xff] }
 0x310   :  { %v565_v40 = vunpack.i.l.bf16 %v564_v39  ;;  %v566_v41 = vunpack.i.h.bf16 %v564_v39  ;;  %493 = vmatpush.msrb.mxu3 %v438_v37 }
 0x312   :  { %321 = vmatpush.msrb.mxu0 %v565_v40  ;;  %v592_v42 = vpop.eup %591  ;;  %494 = vmatpush.msrb.mxu3 %v437_v38 }
 0x313   :  { %v188_v43 = vsel %vm172_vm11, %v592_v42, 0.0 }
 0x314   :  { %322 = vmatpush.msrb.mxu0 %v566_v41  ;;  %v576_v41 = vld [vmem:[%s797_s1 + $0x4c] ss:$0 sm:$0xff] }
 0x317   :  { %189 = vadd.xlane.f32.xlu0 %v188_v43 }
 0x328   :  { %568 = vrot.lane.b32.xlu1 %v562_v18, %s637_s24 }
 0x32b   :  { %343 = vrot.lane.b32.xlu0 %v683_v21, %s638_s25 }
 0x37a   :  { %v287_v44 = vpop.xlane.xlu0 %286 }
 0x37b   :  { %593 = vrcp.f32 %v287_v44 }
 0x381   :  { %v594_v45 = vpop.eup %593 }
 0x382   :  { %v290_v46 = vpop.xlane.xlu1 %289  ;;  %v293_v47 = vmul.f32 %v594_v45, %v586_v29  ;;  %v187_v50 = vpop.xlane.xlu0 %186 }
 0x383   :  { %595 = vrcp.f32 %v290_v46 }
 0x384   :  { %540 = vmatmul.msk.f32.vlgmr.msrb.gmra.mxu0 %vm172_vm11, %v293_v47  ;;  %597 = vrcp.f32 %v187_v50 }
 0x389   :  { %v596_v48 = vpop.eup %595 }
 0x38a   :  { %v294_v49 = vmul.f32 %v596_v48, %v590_v36  ;;  %v190_v51 = vpop.xlane.xlu0 %189  ;;  %v598_v53 = vpop.eup %597  ;;  %v575_v36 = vld [vmem:[%s797_s1 + $0x4b] ss:$0 sm:$0xff] }
 0x38b   :  { %599 = vrcp.f32 %v190_v51  ;;  %v193_v55 = vmul.f32 %v598_v53, %v588_v35 }
 0x38c   :  { %541 = vmatmul.msk.f32.gmra.mxu0 %vm172_vm11, %v294_v49 }
 0x391   :  { %v600_v56 = vpop.eup %599 }
 0x392   :  { %v194_v57 = vmul.f32 %v600_v56, %v592_v42  ;;  %v435_v56 = vld [vmem:[%s797_s1 + $0x28] sm:$0xff] }
 0x39a   :  { %v569_v52 = vpop.permute.xlu1 %568 }
 0x39b   :  { %v570_v54 = vunpack.i.l.bf16 %v569_v52  ;;  %v571_v21 = vunpack.i.h.bf16 %v569_v52 }
 0x39d   :  { %221 = vmatpush.msra.mxu2 %v570_v54  ;;  %v344_v60 = vpop.permute.xlu0 %343 }
 0x39f   :  { %222 = vmatpush.msra.mxu2 %v571_v21 }
 0x3a0   :  { %534 = vmatmul.msk.f32.vlgmr.msra.gmra.mxu2 %vm172_vm11, %v193_v55 }
 0x3a1   :  { %542 = vmatpush.msk.msrb.mxu2 %vm87_vm2, %v344_v60 }
 0x3a8   :  { %535 = vmatmul.msk.f32.gmra.mxu2 %vm172_vm11, %v194_v57  ;;  %v434_v57 = vld [vmem:[%s797_s1 + $0x20] sm:$0xff] }
 0x401   :  { %v324_v58 = vpop.f32.mrf.mxu0 }
 0x402   :  { %332 = vrot.lane.b32.xlu2 %v324_v58, %s639_s26  ;;  %v577_v58 = vld [vmem:[%s797_s1 + $0x4d] ss:$0 sm:$0xff] }
 0x409   :  { %v327_v59 = vpop.f32.mrf.mxu0 }
 0x40a   :  { %341 = vrot.lane.b32.xlu2 %v690_v22, %s638_s25  ;;  %334 = vrot.lane.b32.xlu1 %v327_v59, %s639_s26  ;;  %v574_v22 = vld [vmem:[%s797_s1 + $0x4a] ss:$0 sm:$0xff]  ;;  %s515_s26 = sshll.u32 %s798_s2, 4  ;;  %s516_s26 = int_to_ptr.hbm [resolvable:$true] %s515_s26 }
 0x423   :  { %v224_v62 = vpop.f32.mrf.mxu2 }
 0x42b   :  { %v227_v3 = vpop.f32.mrf.mxu2 }
 0x45c   :  { %v333_v61 = vpop.permute.xlu2 %332 }
 0x45d   :  { %v338_v1 = vsel %vm136_vm9, %v224_v62, %v333_v61 }
 0x464   :  { %v342_v63 = vpop.permute.xlu2 %341 }
 0x465   :  { %369 = vmatpush.msrb.mxu2 %v342_v63 }
 0x466   :  { %543 = vmatmul.msk.f32.vlgmr.msrb.gmra.mxu2 %vm21_vm0, %v338_v1 }
 0x47c   :  { %v335_v4 = vpop.permute.xlu1 %334 }
 0x47d   :  { %v339_v5 = vsel %vm136_vm9, %v227_v3, %v335_v4  ;;  %v578_v3 = vld [vmem:[%s797_s1 + $0x4e] ss:$0 sm:$0xff] }
 0x47e   :  { %544 = vmatmul.msk.f32.gmra.mxu2 %vm21_vm0, %v339_v5 }
 0x4e9   :  { %v371_v6 = vpop.f32.mrf.mxu2 }
 0x4ea   :  { %v377_v7 = vadd.f32 %v371_v6, %v661_v0 }
 0x4ec   :  { %v736_v8 = vadd.f32 %v574_v22, %v377_v7 }
 0x4ee   :  { %v382_v9 = vsel %vm21_vm0, %v736_v8, 0.0 }
 0x4ef   :  { %383 = vadd.xlane.f32.xlu2 %v382_v9 }
 0x501   :  { %v374_v11 = vpop.f32.mrf.mxu2 }
 0x502   :  { %v378_v12 = vadd.f32 %v374_v11, %v668_v2 }
 0x504   :  { %v741_v13 = vadd.f32 %v574_v22, %v378_v12 }
 0x506   :  { %v385_v14 = vsel %vm21_vm0, %v741_v13, 0.0 }
 0x507   :  { %386 = vadd.xlane.f32.xlu0 %v385_v14 }
 0x562   :  { %v384_v15 = vpop.xlane.xlu2 %383 }
 0x563   :  { %v388_v16 = vmul.f32 %v384_v15, %v672_v10 }
 0x565   :  { %v390_v0 = vsub.f32 %v736_v8, %v388_v16 }
 0x567   :  { %v392_v17 = vmul.f32 %v390_v0, %v390_v0 }
 0x569   :  { %v394_v18 = vsel %vm21_vm0, %v392_v17, 0.0 }
 0x56a   :  { %395 = vadd.xlane.f32.xlu1 %v394_v18 }
 0x57a   :  { %v387_v19 = vpop.xlane.xlu0 %386 }
 0x57b   :  { %v389_v20 = vmul.f32 %v387_v19, %v672_v10 }
 0x57d   :  { %v391_v2 = vsub.f32 %v741_v13, %v389_v20 }
 0x57f   :  { %v393_v23 = vmul.f32 %v391_v2, %v391_v2 }
 0x581   :  { %v397_v24 = vsel %vm21_vm0, %v393_v23, 0.0 }
 0x582   :  { %398 = vadd.xlane.f32.xlu2 %v397_v24 }
 0x5dd   :  { %v396_v27 = vpop.xlane.xlu1 %395 }
 0x5de   :  { %v400_v28 = vmul.f32 %v396_v27, %v672_v10 }
 0x5e0   :  { %v402_v29 = vadd.f32 1e-05, %v400_v28 }
 0x5e2   :  { %601 = vrsqrt.f32 %v402_v29  ;;  %vm410_vm4 = vweird.f32 %v402_v29 }
 0x5e8   :  { %v602_v30 = vpop.eup %601 }
 0x5e9   :  { %v405_v31 = vmul.f32 %v602_v30, %v402_v29  ;;  %vm411_vm3 = vweird.f32 %v602_v30 }
 0x5ea   :  { %vm412_vm2 = vmor %vm410_vm4, %vm411_vm3 }
 0x5eb   :  { %v406_v32 = vmul.f32 %v602_v30, %v405_v31 }
 0x5ed   :  { %v407_v33 = vmul.f32 0.5, %v406_v32 }
 0x5ef   :  { %v408_v34 = vsub.f32 1.5, %v407_v33 }
 0x5f1   :  { %v409_v35 = vmul.f32 %v602_v30, %v408_v34 }
 0x5f3   :  { %v413_v39 = vsel %vm412_vm2, %v602_v30, %v409_v35 }
 0x5f4   :  { %v424_v40 = vmul.f32 %v413_v39, %v390_v0 }
 0x5f5   :  { %v399_v42 = vpop.xlane.xlu2 %398 }
 0x5f6   :  { %v401_v43 = vmul.f32 %v399_v42, %v672_v10  ;;  %v427_v44 = vmul.f32 %v575_v36, %v424_v40  ;;  %v436_v10 = vld [vmem:[%s797_s1 + $0x30] sm:$0xff]  ;;  %s641_s1 = smov 128  }
 0x5f7   :  { %495 = vmatpush.msrb.mxu3 %v436_v10 }
 0x5f8   :  { %v403_v45 = vadd.f32 1e-05, %v401_v43  ;;  %v430_v46 = vadd.f32 %v576_v41, %v427_v44 }
 0x5f9   :  { %496 = vmatpush.msrb.mxu3 %v435_v56 }
 0x5fa   :  { %603 = vrsqrt.f32 %v403_v45  ;;  %546 = vmatmul.msk.f32.vlgmr.msrb.gmra.mxu1 %vm21_vm0, %v430_v46  ;;  %vm420_vm6 = vweird.f32 %v403_v45 }
 0x5fb   :  { %497 = vmatpush.msrb.mxu3 %v434_v57 }
 0x600   :  { %v604_v47 = vpop.eup %603 }
 0x601   :  { %v415_v48 = vmul.f32 %v604_v47, %v403_v45  ;;  %vm421_vm5 = vweird.f32 %v604_v47 }
 0x602   :  { %vm422_vm7 = vmor %vm420_vm6, %vm421_vm5 }
 0x603   :  { %v416_v49 = vmul.f32 %v604_v47, %v415_v48 }
 0x605   :  { %v417_v50 = vmul.f32 0.5, %v416_v49 }
 0x607   :  { %v418_v51 = vsub.f32 1.5, %v417_v50 }
 0x609   :  { %v419_v52 = vmul.f32 %v604_v47, %v418_v51 }
 0x60b   :  { %v423_v53 = vsel %vm422_vm7, %v604_v47, %v419_v52 }
 0x60c   :  { %v425_v54 = vmul.f32 %v423_v53, %v391_v2 }
 0x60e   :  { %v428_v21 = vmul.f32 %v575_v36, %v425_v54 }
 0x610   :  { %v431_v55 = vadd.f32 %v576_v41, %v428_v21 }
 0x612   :  { %547 = vmatmul.msk.f32.gmra.mxu1 %vm21_vm0, %v431_v55 }
 0x677   :  { %v466_v59 = vpop.f32.mrf.mxu1 }
 0x678   :  { %v467_v60 = vadd.f32 %v577_v58, %v466_v59 }
 0x67a   :  { %v472_v61 = vmax.f32 %v467_v60, 0.0 }
 0x67c   :  { %548 = vmatmul.msk.f32.vlgmr.msrb.gmra.mxu3 %vm475_vm8, %v472_v61 }
 0x68f   :  { %v469_v62 = vpop.f32.mrf.mxu1 }
 0x690   :  { %v470_v63 = vadd.f32 %v577_v58, %v469_v62 }
 0x692   :  { %v473_v1 = vmax.f32 %v470_v63, 0.0 }
 0x694   :  { %549 = vmatmul.msk.f32.gmra.mxu3 %vm475_vm8, %v473_v1 }
 0x6ff   :  { %v499_v4 = vpop.f32.mrf.mxu3 }
 0x700   :  { %v500_v5 = vadd.f32 %v578_v3, %v499_v4 }
 0x702   :  { %v505_v22 = vadd.f32 %v500_v5, %v736_v8 }
 0x704   :  { %507 = vst.msk [vmem:[#allocation2] sm:$0xff] %vm21_vm0, %v505_v22 }
 0x717   :  { %v502_v6 = vpop.f32.mrf.mxu3 }
 0x718   :  { %v503_v7 = vadd.f32 %v578_v3, %v502_v6 }
 0x71a   :  { %v506_v9 = vadd.f32 %v503_v7, %v741_v13 }
 0x71c   :  { %508 = vst.msk [vmem:[#allocation2 + $0x8] sm:$0xff] %vm21_vm0, %v506_v9 }
 0x71d   :  { %521 = dma.vmem_to_hbm [thread:$0]  %s514_s23, 256, %s516_s26, [#allocation3], %s641_s1, %s641_s1, %s642_s27  }
 0x71e   :  { %629 = dma.done.wait [#allocation3], 256  }
 0x71f   :  { %630 = vsyncadd [#allocation3], 4294967040 }
 0x720   :  { %526 = vsyncpa [#allocation3], 1 }

</bundles_post_ra>
